<compile_context>
chip_gen: v5e
topology: v5e:2x2
jax: 0.10.0
libtpu: 0.0.40
codegen_flags: <defaults>
</compile_context>

<pallas_src>
import functools

import jax
import jax.numpy as jnp
from jax import lax
from jax.experimental import pallas as pl
from jax.experimental.pallas import tpu as pltpu


def _cdiv(a, b):
    return -(-a // b)


def _round_up(n, m):
    return _cdiv(n, m) * m


def mlp_kernel(x_ref, w1_ref, b1_ref, w2_ref, b2_ref, ot_ref):
    # x  : (bm, xdim)  -- batch tile in its native layout (no wrapper transpose)
    # w1 : (hdim, xdim)   b1 : (hdim, 1)     (PyTorch nn.Linear layout)
    # w2 : (udim, hdim)   b2 : (udim, 1)
    # out: (udim, bm)   -- batch on the 128-lane axis -> unmasked stores
    x = x_ref[...].astype(jnp.float32)          # f32 compute everywhere (v5e-safe)
    # h_t[j, b] = sum_k W1[j, k] * x[b, k]  -> (hdim, bm), lane-dense in batch.
    h = lax.dot_general(w1_ref[...], x, (((1,), (1,)), ((), ())),
                        preferred_element_type=jnp.float32)
    h = jnp.maximum(h + b1_ref[...], 0.0)
    y = jnp.dot(w2_ref[...], h, preferred_element_type=jnp.float32) + b2_ref[...]
    ot_ref[...] = y.astype(ot_ref.dtype)


def _pick_bm(B, xdim, hdim, udim, bm_max):
    # Lane-dense tile: multiple of 128.
    bm_max = max(128, (int(bm_max) // 128) * 128)
    bm = min(bm_max, _round_up(B, 128))
    if B > 128:
        # Guarantee >= 2 grid steps so the "parallel" axis shards across both
        # v7x TensorCores (no effect on v5e/v6e, 1 TC).
        bm = min(bm, _round_up(_cdiv(B, 2), 128))
    # VMEM re-derivation (v7x: 64 MiB physical).  Per batch row the pipeline
    # holds: double-buffered x block, lane-padded to a multiple of 128 lanes;
    # double-buffered y block, sublane-padded to 8; plus f32 in-kernel
    # intermediates (x^T, h, relu(h), y).
    x_row = 2 * _round_up(xdim, 128) * 4
    y_row = 2 * _round_up(udim, 8) * 4
    tmp_row = (_round_up(xdim, 8) + 2 * hdim + _round_up(udim, 8)) * 4
    bytes_per_row = x_row + y_row + tmp_row
    vmem_budget = 40 * 1024 * 1024            # headroom under the 48 MiB limit
    bm_cap = max(128, (vmem_budget // bytes_per_row) // 128 * 128)
    return min(bm, bm_cap)


@functools.partial(jax.jit, static_argnames=("bm_max", "lane_major_output"))
def q_t_forward(x, w1, b1, w2, b2, *, bm_max=32768, lane_major_output=False):
    """q_t forward pass.  Weights are in PyTorch nn.Linear layout:
    w1 (hdim, xdim), b1 (hdim,), w2 (udim, hdim), b2 (udim,).
    Returns (B, udim); with lane_major_output=True returns (udim, B) so a
    downstream argmax-over-actions can skip the output transpose."""
    B, xdim = x.shape
    hdim = w1.shape[0]
    udim = w2.shape[0]
    out_dtype = x.dtype

    bm = _pick_bm(B, xdim, hdim, udim, bm_max)
    grid = (_cdiv(B, bm),)                    # ragged last block handled by Pallas

    # Tiny VMEM-resident weights/biases, f32 for accumulation-friendly math.
    w1_c = w1.astype(jnp.float32)
    b1_c = b1.reshape(hdim, 1).astype(jnp.float32)
    w2_c = w2.astype(jnp.float32)
    b2_c = b2.reshape(udim, 1).astype(jnp.float32)

    out_itemsize = jnp.dtype(out_dtype).itemsize
    cost = pl.CostEstimate(
        flops=2 * B * (xdim * hdim + hdim * udim),
        transcendentals=0,
        bytes_accessed=(x.size * x.dtype.itemsize
                        + 4 * (w1_c.size + b1_c.size + w2_c.size + b2_c.size)
                        + udim * B * out_itemsize),
    )

    y_t = pl.pallas_call(
        mlp_kernel,
        out_shape=jax.ShapeDtypeStruct((udim, B), out_dtype),
        grid=grid,
        in_specs=[
            pl.BlockSpec((bm, xdim), lambda i: (i, 0)),     # x tile, native layout
            pl.BlockSpec((hdim, xdim), lambda i: (0, 0)),   # W1 (VMEM-resident)
            pl.BlockSpec((hdim, 1), lambda i: (0, 0)),      # b1
            pl.BlockSpec((udim, hdim), lambda i: (0, 0)),   # W2 (VMEM-resident)
            pl.BlockSpec((udim, 1), lambda i: (0, 0)),      # b2
        ],
        out_specs=pl.BlockSpec((udim, bm), lambda i: (0, i)),   # lane-dense store
        compiler_params=pltpu.CompilerParams(
            dimension_semantics=("parallel",),      # megacore sharding on v7x
            vmem_limit_bytes=48 * 1024 * 1024,      # < v7x 64 MiB physical
        ),
        cost_estimate=cost,
    )(x, w1_c, b1_c, w2_c, b2_c)

    if lane_major_output:
        return y_t                              # (udim, B)
    return y_t.T                                # (B, udim): nn.Module semantics


def init_params(key, xdim, udim, hdim=16, dtype=jnp.float32):
    # nn.Linear default init: U(-1/sqrt(fan_in), 1/sqrt(fan_in)), (out, in) layout.
    k1, k2, k3, k4 = jax.random.split(key, 4)
    s1 = 1.0 / float(jnp.sqrt(jnp.float32(xdim)))
    s2 = 1.0 / float(jnp.sqrt(jnp.float32(hdim)))
    w1 = jax.random.uniform(k1, (hdim, xdim), dtype, minval=-s1, maxval=s1)
    b1 = jax.random.uniform(k2, (hdim,), dtype, minval=-s1, maxval=s1)
    w2 = jax.random.uniform(k3, (udim, hdim), dtype, minval=-s2, maxval=s2)
    b2 = jax.random.uniform(k4, (udim,), dtype, minval=-s2, maxval=s2)
    return w1, b1, w2, b2


def reference(x, w1, b1, w2, b2):
    return jnp.maximum(x @ w1.T + b1, 0.0) @ w2.T + b2


if __name__ == "__main__":
    key = jax.random.PRNGKey(0)
    kx1, kx2, kx3, kp = jax.random.split(key, 4)

    xdim, udim, hdim = 4, 2, 16
    w1, b1, w2, b2 = init_params(kp, xdim, udim, hdim)

    # 1) Small deterministic batch: single (ragged) grid step.
    x1 = jax.random.normal(kx1, (8, xdim), dtype=jnp.float32)
    out1 = q_t_forward(x1, w1, b1, w2, b2)
    jax.block_until_ready(out1)
    assert out1.shape == (8, udim)
    assert jnp.allclose(out1, reference(x1, w1, b1, w2, b2), atol=1e-5, rtol=1e-5)

    # 2) Ragged batch, multi-step "parallel" grid, masked last block (no pad/slice).
    x2 = jax.random.normal(kx2, (300, xdim), dtype=jnp.float32)
    out2 = q_t_forward(x2, w1, b1, w2, b2, bm_max=128)          # grid = 3
    jax.block_until_ready(out2)
    assert out2.shape == (300, udim)
    assert jnp.allclose(out2, reference(x2, w1, b1, w2, b2), atol=1e-5, rtol=1e-5)

    # Same batch with the default (large) tile and lane-major output, so a
    # downstream argmax-over-actions (q_t.control) could skip the transpose.
    out2t = q_t_forward(x2, w1, b1, w2, b2, lane_major_output=True)   # grid = 2
    jax.block_until_ready(out2t)
    assert out2t.shape == (udim, 300)
    assert jnp.allclose(out2t.T, reference(x2, w1, b1, w2, b2), atol=1e-5, rtol=1e-5)

    # 3) bf16 streaming (halves HBM traffic on v6e/v7x); arithmetic stays f32.
    x3 = jax.random.normal(kx3, (64, xdim), dtype=jnp.float32)
    x3_bf16 = x3.astype(jnp.bfloat16)
    out3 = q_t_forward(x3_bf16, w1, b1, w2, b2)
    jax.block_until_ready(out3)
    assert out3.shape == (64, udim) and out3.dtype == jnp.bfloat16
    ref3 = reference(x3_bf16.astype(jnp.float32), w1, b1, w2, b2)
    assert jnp.allclose(out3.astype(jnp.float32), ref3, atol=1e-1, rtol=1e-1)

    # TODO(synk): q_t.control (argmax + host-side epsilon-greedy numpy RNG) is
    # policy logic outside the forward pass and is not implemented as a kernel.
    print("KERNEL_OK")
</pallas_src>

<mosaic_0001>
module attributes {stable_mosaic.version = 11 : i64} {
  func.func @mlp_kernel(%arg0: i32, %arg1: memref<128x4xf32, #tpu.memory_space<vmem>>, %arg2: memref<16x4xf32, #tpu.memory_space<vmem>>, %arg3: memref<16x1xf32, #tpu.memory_space<vmem>>, %arg4: memref<2x16xf32, #tpu.memory_space<vmem>>, %arg5: memref<2x1xf32, #tpu.memory_space<vmem>>, %arg6: memref<2x128xf32, #tpu.memory_space<vmem>>) attributes {dimension_semantics = [#tpu.dimension_semantics<parallel>], iteration_bounds = array<i64: 1>, scalar_prefetch = 0 : i64, scratch_operands = 0 : i64, tpu.core_type = #tpu.core_type<tc>, window_params = [{transform_indices = @transform_0, window_bounds = array<i64: 128, 4>}, {pipeline_mode = #tpu.pipeline_mode<synchronous>, transform_indices = @transform_1, window_bounds = array<i64: 16, 4>}, {pipeline_mode = #tpu.pipeline_mode<synchronous>, transform_indices = @transform_2, window_bounds = array<i64: 16, 1>}, {pipeline_mode = #tpu.pipeline_mode<synchronous>, transform_indices = @transform_3, window_bounds = array<i64: 2, 16>}, {pipeline_mode = #tpu.pipeline_mode<synchronous>, transform_indices = @transform_4, window_bounds = array<i64: 2, 1>}, {transform_indices = @transform_5, window_bounds = array<i64: 2, 128>}]} {
    %c0 = arith.constant 0 : index
    %c0_0 = arith.constant 0 : index
    %0 = vector.load %arg1[%c0, %c0_0] : memref<128x4xf32, #tpu.memory_space<vmem>>, vector<128x4xf32>
    %c0_1 = arith.constant 0 : index
    %c0_2 = arith.constant 0 : index
    %1 = vector.load %arg2[%c0_1, %c0_2] : memref<16x4xf32, #tpu.memory_space<vmem>>, vector<16x4xf32>
    %cst = arith.constant dense<0.000000e+00> : vector<16x128xf32>
    %2 = tpu.matmul %1, %0, %cst {dimension_numbers = #tpu.dot_dimension_numbers<[1], [1], [0], [0], [0, 0, 1, 0], [], []>} : vector<16x4xf32>, vector<128x4xf32>, vector<16x128xf32> -> vector<16x128xf32>
    %c0_3 = arith.constant 0 : index
    %c0_4 = arith.constant 0 : index
    %3 = vector.load %arg3[%c0_3, %c0_4] : memref<16x1xf32, #tpu.memory_space<vmem>>, vector<16x1xf32>
    %4 = vector.broadcast %3 : vector<16x1xf32> to vector<16x128xf32>
    %5 = arith.addf %2, %4 : vector<16x128xf32>
    %cst_5 = arith.constant 0.000000e+00 : f32
    %6 = vector.broadcast %cst_5 : f32 to vector<16x128xf32>
    %7 = arith.maximumf %5, %6 : vector<16x128xf32>
    %c0_6 = arith.constant 0 : index
    %c0_7 = arith.constant 0 : index
    %8 = vector.load %arg4[%c0_6, %c0_7] : memref<2x16xf32, #tpu.memory_space<vmem>>, vector<2x16xf32>
    %cst_8 = arith.constant dense<0.000000e+00> : vector<2x128xf32>
    %9 = tpu.matmul %8, %7, %cst_8 {dimension_numbers = #tpu.dot_dimension_numbers<[1], [0], [0], [1], [0, 0, 1, 1], [], []>} : vector<2x16xf32>, vector<16x128xf32>, vector<2x128xf32> -> vector<2x128xf32>
    %c0_9 = arith.constant 0 : index
    %c0_10 = arith.constant 0 : index
    %10 = vector.load %arg5[%c0_9, %c0_10] : memref<2x1xf32, #tpu.memory_space<vmem>>, vector<2x1xf32>
    %11 = vector.broadcast %10 : vector<2x1xf32> to vector<2x128xf32>
    %12 = arith.addf %9, %11 : vector<2x128xf32>
    %c0_11 = arith.constant 0 : index
    %c0_12 = arith.constant 0 : index
    %13 = vector.load %arg6[%c0_11, %c0_12] : memref<2x128xf32, #tpu.memory_space<vmem>>, vector<2x128xf32>
    tpu.vector_store %arg6[%c0_11, %c0_12], %12 {strides = array<i32>} : memref<2x128xf32, #tpu.memory_space<vmem>>, vector<2x128xf32>,
    return
  }
  func.func @transform_0(%arg0: i32) -> (i32, i32) {
    %c0_i32 = arith.constant 0 : i32
    %c0_i32_0 = arith.constant 0 : i32
    return %arg0, %c0_i32 : i32, i32
  }
  func.func @transform_1(%arg0: i32) -> (i32, i32) {
    %c0_i32 = arith.constant 0 : i32
    %c0_i32_0 = arith.constant 0 : i32
    %c0_i32_1 = arith.constant 0 : i32
    return %c0_i32, %c0_i32_0 : i32, i32
  }
  func.func @transform_2(%arg0: i32) -> (i32, i32) {
    %c0_i32 = arith.constant 0 : i32
    %c0_i32_0 = arith.constant 0 : i32
    %c0_i32_1 = arith.constant 0 : i32
    return %c0_i32, %c0_i32_0 : i32, i32
  }
  func.func @transform_3(%arg0: i32) -> (i32, i32) {
    %c0_i32 = arith.constant 0 : i32
    %c0_i32_0 = arith.constant 0 : i32
    %c0_i32_1 = arith.constant 0 : i32
    return %c0_i32, %c0_i32_0 : i32, i32
  }
  func.func @transform_4(%arg0: i32) -> (i32, i32) {
    %c0_i32 = arith.constant 0 : i32
    %c0_i32_0 = arith.constant 0 : i32
    %c0_i32_1 = arith.constant 0 : i32
    return %c0_i32, %c0_i32_0 : i32, i32
  }
  func.func @transform_5(%arg0: i32) -> (i32, i32) {
    %c0_i32 = arith.constant 0 : i32
    %c0_i32_0 = arith.constant 0 : i32
    return %c0_i32, %arg0 : i32, i32
  }
}

</mosaic_0001>

<bundles_post_ra>
// kernel: q_t_forward.1
= control target key start
LH: loop header
LB: loop body
LE: loop exit
PB: predicated region body
PF: predicated region fallthrough
CT: control target
= control target key end

     0   :  { %vm51_vm0 = vcmask 31744   ;;  %s379_s0 = inlined_call_operand.vmem [shape: f32[8,4], index: 0, kind: input, shape index: {}]   ;;  %s380_s1 = inlined_call_operand.vmem [shape: f32[16,4], index: 1, kind: input, shape index: {}]   ;;  %s381_s2 = inlined_call_operand.vmem [shape: f32[16,1], index: 2, kind: input, shape index: {}]   ;;  %s382_s3 = inlined_call_operand.vmem [shape: f32[2,16], index: 3, kind: input, shape index: {}]   ;;  %s383_s4 = inlined_call_operand.vmem [shape: f32[2,1], index: 4, kind: input, shape index: {}]   ;;  %s384_s5 = inlined_call_operand.hbm [shape: f32[2,8], index: 5, kind: output, shape index: {}]  }
   0x1   :  { %v36_v0 = vld [vmem:[%s379_s0 + $0x78] sm:$0xff]  ;;  %v35_v1 = vld [vmem:[%s379_s0 + $0x70] sm:$0xff] }
   0x2   :  { %179 = vmatpush.xpose.msk.msra.mxu0 %vm51_vm0, %v36_v0  ;;  %198 = vmatpush.xpose.msk.msra.mxu2 %vm51_vm0, %v36_v0 }
   0x3   :  { %10 = vsyncpa [#allocation3], 0  ;;  %v34_v2 = vld [vmem:[%s379_s0 + $0x68] sm:$0xff]  ;;  %v33_v3 = vld [vmem:[%s379_s0 + $0x60] sm:$0xff]  ;;  %v244_v11 = vmov 0   ;;  %vm138_vm1 = vcmask 130048  }
   0x4   :  { %v32_v4 = vld [vmem:[%s379_s0 + $0x58] sm:$0xff]  ;;  %v31_v5 = vld [vmem:[%s379_s0 + $0x50] sm:$0xff]  ;;  %v30_v6 = vld [vmem:[%s379_s0 + $0x48] sm:$0xff]  ;;  %216 = vset.pattern.permute.xlu0 %v244_v11  ;;  %217 = vset.pattern.permute.xlu1 %v244_v11  ;;  %s245_s9 = smov [#allocation2]   ;;  %s170_s12 = sshll.u32 %s384_s5, 4  ;;  %s171_s12 = int_to_ptr.hbm [resolvable:$true] %s170_s12 }
   0x5   :  { %v29_v7 = vld [vmem:[%s379_s0 + $0x40] sm:$0xff]  ;;  %v28_v8 = vld [vmem:[%s379_s0 + $0x38] sm:$0xff]  ;;  %v40_v9 = vld [vmem:[%s381_s2 + $0x8] sm:$0xff] }
   0x6   :  { %180 = vmatpush.xpose.msk.msra.mxu0 %vm51_vm0, %v35_v1  ;;  %199 = vmatpush.xpose.msk.msra.mxu2 %vm51_vm0, %v35_v1  ;;  %v27_v10 = vld [vmem:[%s379_s0 + $0x30] sm:$0xff]  ;;  %v26_v12 = vld [vmem:[%s379_s0 + $0x28] sm:$0xff]  ;;  %v39_v13 = vld [vmem:[%s381_s2] sm:$0xff] }
   0x7   :  { %48 = vperm.xlu0 %216, %v40_v9   ;;  %v25_v14 = vld [vmem:[%s379_s0 + $0x20] sm:$0xff]  ;;  %v24_v15 = vld [vmem:[%s379_s0 + $0x18] sm:$0xff]  ;;  %v23_v16 = vld [vmem:[%s379_s0 + $0x10] sm:$0xff] }
   0x8   :  { %v22_v17 = vld [vmem:[%s379_s0 + $0x8] sm:$0xff]  ;;  %v21_v18 = vld [vmem:[%s379_s0] sm:$0xff] }
   0x9   :  { %v37_v19 = vld [vmem:[%s380_s1] sm:$0xff]  ;;  %v38_v20 = vld [vmem:[%s380_s1 + $0x8] sm:$0xff] }
   0xa   :  { %181 = vmatpush.xpose.msk.msra.mxu0 %vm51_vm0, %v34_v2  ;;  %200 = vmatpush.xpose.msk.msra.mxu2 %vm51_vm0, %v34_v2  ;;  %v132_v21 = vld [vmem:[%s383_s4] sm:$0x3]  ;;  %s168_s4 = sshll.u32 %s245_s9, 4  ;;  %s169_s4 = int_to_ptr.vmem [resolvable:$true] %s168_s4 }
   0xb   :  { %135 = vperm.xlu1 %217, %v132_v21   ;;  %v131_v30 = vld [vmem:[%s382_s3] sm:$0x3] }
   0xe   :  { %182 = vmatpush.xpose.msk.msra.mxu0 %vm51_vm0, %v33_v3  ;;  %201 = vmatpush.xpose.msk.msra.mxu2 %vm51_vm0, %v33_v3 }
   0xf   :  { %43 = vperm.xlu0 %216, %v39_v13  }
  0x12   :  { %183 = vmatpush.xpose.msk.msra.mxu0 %vm51_vm0, %v32_v4  ;;  %202 = vmatpush.xpose.msk.msra.mxu2 %vm51_vm0, %v32_v4 }
  0x16   :  { %184 = vmatpush.xpose.msk.msra.mxu0 %vm51_vm0, %v31_v5  ;;  %203 = vmatpush.xpose.msk.msra.mxu2 %vm51_vm0, %v31_v5 }
  0x1a   :  { %185 = vmatpush.xpose.msk.msra.mxu0 %vm51_vm0, %v30_v6  ;;  %204 = vmatpush.xpose.msk.msra.mxu2 %vm51_vm0, %v30_v6 }
  0x1e   :  { %186 = vmatpush.xpose.msk.msra.mxu0 %vm51_vm0, %v29_v7  ;;  %205 = vmatpush.xpose.msk.msra.mxu2 %vm51_vm0, %v29_v7 }
  0x22   :  { %187 = vmatpush.xpose.msk.msra.mxu0 %vm51_vm0, %v28_v8  ;;  %206 = vmatpush.xpose.msk.msra.mxu2 %vm51_vm0, %v28_v8 }
  0x26   :  { %188 = vmatpush.xpose.msk.msra.mxu0 %vm51_vm0, %v27_v10  ;;  %207 = vmatpush.xpose.msk.msra.mxu2 %vm51_vm0, %v27_v10 }
  0x2a   :  { %189 = vmatpush.xpose.msk.msra.mxu0 %vm51_vm0, %v26_v12  ;;  %208 = vmatpush.xpose.msk.msra.mxu2 %vm51_vm0, %v26_v12 }
  0x2e   :  { %190 = vmatpush.xpose.msk.msra.mxu0 %vm51_vm0, %v25_v14  ;;  %209 = vmatpush.xpose.msk.msra.mxu2 %vm51_vm0, %v25_v14 }
  0x32   :  { %191 = vmatpush.xpose.msk.msra.mxu0 %vm51_vm0, %v24_v15  ;;  %210 = vmatpush.xpose.msk.msra.mxu2 %vm51_vm0, %v24_v15 }
  0x36   :  { %192 = vmatpush.xpose.msk.msra.mxu0 %vm51_vm0, %v23_v16  ;;  %211 = vmatpush.xpose.msk.msra.mxu2 %vm51_vm0, %v23_v16 }
  0x3a   :  { %193 = vmatpush.xpose.msk.msra.mxu0 %vm51_vm0, %v22_v17  ;;  %212 = vmatpush.xpose.msk.msra.mxu2 %vm51_vm0, %v22_v17 }
  0x3e   :  { %194 = vmatpush.xpose.msk.msra.mxu0 %vm51_vm0, %v21_v18  ;;  %213 = vmatpush.xpose.msk.msra.mxu2 %vm51_vm0, %v21_v18 }
  0x41   :  { %195 = vmatmul.msk.f32.vlgmr.msra.gmra.mxu0 %vm51_vm0, %v37_v19  ;;  %196 = vmatmul.msk.f32.vlgmr.msra.gmra.mxu2 %vm51_vm0, %v38_v20 }
  0x79   :  { %v49_v22 = vpop.permute.xlu0 %48 }
  0x7d   :  { %v136_v31 = vpop.permute.xlu1 %135 }
  0x81   :  { %v44_v23 = vpop.permute.xlu0 %43 }
  0xbe   :  { %v123_v24 = vpop.f32.mrf.mxu0 }
  0xbf   :  { %v124_v26 = vadd.f32 %v123_v24, %v44_v23 }
  0xc1   :  { %v129_v29 = vmax.f32 %v124_v26, 0.0 }
  0xc4   :  { %v126_v25 = vpop.f32.mrf.mxu2 }
  0xc5   :  { %v127_v27 = vadd.f32 %v126_v25, %v49_v22 }
  0xc7   :  { %v130_v28 = vmax.f32 %v127_v27, 0.0 }
  0xc9   :  { %156 = vmatpush.msra.mxu1 %v130_v28 }
  0xcb   :  { %157 = vmatpush.msra.mxu1 %v129_v29 }
  0xcc   :  { %197 = vmatmul.msk.f32.vlgmr.msra.gmra.mxu1 %vm138_vm1, %v131_v30 }
 0x149   :  { %v159_v32 = vpop.f32.mrf.mxu1 }
 0x14a   :  { %v160_v33 = vadd.f32 %v159_v32, %v136_v31 }
 0x14c   :  { %162 = vst [vmem:[#allocation2] sm:$0x3] %v160_v33 }
 0x14d   :  { %173 = dma.vmem_to_hbm [thread:$0]  %s169_s4, 32, %s171_s12, [#allocation3]  }
 0x14e   :  { %242 = dma.done.wait [#allocation3], 32  }
 0x14f   :  { %243 = vsyncadd [#allocation3], 4294967264 }
 0x150   :  { %178 = vsyncpa [#allocation3], 1 }

</bundles_post_ra>
